<compile_context>
chip_gen: v5e
topology: v5e:2x2
jax: 0.10.0
libtpu: 0.0.40
codegen_flags: <defaults>
</compile_context>

<pallas_src>
import jax
import jax.numpy as jnp
from jax.experimental import pallas as pl
from jax.experimental.pallas import tpu as pltpu


# ---------------------------------------------------------------------------
# Kernels
# ---------------------------------------------------------------------------
def _matmul_resident_kernel(x_ref, w_ref, o_ref):
    # Whole weight is resident in VMEM; one full-K matmul per M tile.
    o_ref[...] = jnp.dot(x_ref[...], w_ref[...], preferred_element_type=jnp.float32)


def _matmul_stream_kernel(x_ref, w_ref, o_ref):
    # Accumulate over the K grid axis directly into the resident f32 output block.
    @pl.when(pl.program_id(2) == 0)
    def _():
        o_ref[...] = jnp.zeros_like(o_ref)

    o_ref[...] += jnp.dot(x_ref[...], w_ref[...], preferred_element_type=jnp.float32)


# ---------------------------------------------------------------------------
# Wrapper
# ---------------------------------------------------------------------------
def _round_block(dim, target, align):
    """Full extent if the dim is small, otherwise an `align`-multiple tile."""
    if dim <= target:
        return dim  # block == full array dim is always legal
    return (target // align) * align


def embedding_matmul(x2d, weight, *, force_stream=False):
    """x2d: (M, V) f32, weight: (V, E) f32 -> (M, E) f32."""
    M, K = x2d.shape
    K2, N = weight.shape
    assert K == K2

    tm = _round_block(M, 256, 8)

    # --- Path A: keep the whole weight resident in VMEM ---------------------
    # Budget (double-buffered, f32) kept well under the smallest default
    # scoped-VMEM limit (16 MiB on v5e) so it is safe on v5e/v6e/v7x.
    w_bytes = K * N * 4
    x_bytes = tm * K * 4
    o_bytes = tm * N * 4
    fits_resident = (2 * (w_bytes + x_bytes + o_bytes)) <= (10 << 20)

    if fits_resident and not force_stream:
        grid = (pl.cdiv(M, tm),)
        return pl.pallas_call(
            _matmul_resident_kernel,
            out_shape=jax.ShapeDtypeStruct((M, N), jnp.float32),
            grid_spec=pltpu.PrefetchScalarGridSpec(
                num_scalar_prefetch=0,
                grid=grid,
                in_specs=[
                    pl.BlockSpec((tm, K), lambda i: (i, 0)),
                    # Constant index_map -> weight DMA'd once, stays resident.
                    pl.BlockSpec((K, N), lambda i: (0, 0)),
                ],
                out_specs=pl.BlockSpec((tm, N), lambda i: (i, 0)),
            ),
            compiler_params=pltpu.CompilerParams(
                dimension_semantics=("parallel",),
            ),
        )(x2d, weight)

    # --- Path B: streaming 3-D grid matmul with large tiles -----------------
    tn = _round_block(N, 512, 128)
    tk = _round_block(K, 512, 128)
    grid = (pl.cdiv(M, tm), pl.cdiv(N, tn), pl.cdiv(K, tk))
    return pl.pallas_call(
        _matmul_stream_kernel,
        out_shape=jax.ShapeDtypeStruct((M, N), jnp.float32),
        grid_spec=pltpu.PrefetchScalarGridSpec(
            num_scalar_prefetch=0,
            grid=grid,
            in_specs=[
                pl.BlockSpec((tm, tk), lambda i, j, k: (i, k)),
                pl.BlockSpec((tk, tn), lambda i, j, k: (k, j)),
            ],
            out_specs=pl.BlockSpec((tm, tn), lambda i, j, k: (i, j)),
        ),
        compiler_params=pltpu.CompilerParams(
            dimension_semantics=("parallel", "parallel", "arbitrary"),
            vmem_limit_bytes=32 << 20,
        ),
    )(x2d, weight)


class EmbeddingPallas:
    """Mirrors the PyTorch Embedding module: (x.squeeze(1) @ W).unsqueeze(1)."""

    def __init__(self, vocab_size, embedding_dim, key):
        # torch.randn equivalent: standard normal, float32.
        self.weight = jax.random.normal(
            key, (vocab_size, embedding_dim), dtype=jnp.float32
        )

    def __call__(self, x):
        # x: (B, 1, S, V)  ->  out: (B, 1, S, E)
        B, one, S, V = x.shape
        assert one == 1
        x2d = x.reshape(B * S, V)  # squeeze(1) + flatten batch/seq (plain-JAX glue)
        out2d = embedding_matmul(x2d, self.weight)
        E = self.weight.shape[1]
        return out2d.reshape(B, S, E)[:, None, :, :]  # unsqueeze(1)


if __name__ == "__main__":
    key = jax.random.PRNGKey(0)
    k_w, k_x = jax.random.split(key)

    B, S, V, E = 2, 8, 128, 128
    module = EmbeddingPallas(vocab_size=V, embedding_dim=E, key=k_w)
    x = jax.random.normal(k_x, (B, 1, S, V), dtype=jnp.float32)

    # Resident-weight path (the one these shapes select).
    out = module(x)
    out = jax.block_until_ready(out)

    ref = (jnp.squeeze(x, axis=1) @ module.weight)[:, None, :, :]
    assert out.shape == (B, 1, S, E)
    assert jnp.allclose(out, ref, atol=1e-4, rtol=1e-4)

    # Also exercise the streaming (3-D grid, accumulate-into-output) path.
    out_stream = embedding_matmul(x.reshape(B * S, V), module.weight,
                                  force_stream=True)
    out_stream = jax.block_until_ready(out_stream)
    assert jnp.allclose(out_stream.reshape(B, 1, S, E), ref, atol=1e-4, rtol=1e-4)

    print("KERNEL_OK")
</pallas_src>

<mosaic_0001>
module attributes {stable_mosaic.version = 11 : i64} {
  func.func @_matmul_resident_kernel(%arg0: i32, %arg1: memref<16x128xf32, #tpu.memory_space<vmem>>, %arg2: memref<128x128xf32, #tpu.memory_space<vmem>>, %arg3: memref<16x128xf32, #tpu.memory_space<vmem>>) attributes {dimension_semantics = [#tpu.dimension_semantics<parallel>], iteration_bounds = array<i64: 1>, scalar_prefetch = 0 : i64, scratch_operands = 0 : i64, tpu.core_type = #tpu.core_type<tc>, window_params = [{transform_indices = @transform_0, window_bounds = array<i64: 16, 128>}, {pipeline_mode = #tpu.pipeline_mode<synchronous>, transform_indices = @transform_1, window_bounds = array<i64: 128, 128>}, {transform_indices = @transform_2, window_bounds = array<i64: 16, 128>}]} {
    %c0 = arith.constant 0 : index
    %c0_0 = arith.constant 0 : index
    %0 = vector.load %arg1[%c0, %c0_0] : memref<16x128xf32, #tpu.memory_space<vmem>>, vector<16x128xf32>
    %c0_1 = arith.constant 0 : index
    %c0_2 = arith.constant 0 : index
    %1 = vector.load %arg2[%c0_1, %c0_2] : memref<128x128xf32, #tpu.memory_space<vmem>>, vector<128x128xf32>
    %cst = arith.constant dense<0.000000e+00> : vector<16x128xf32>
    %2 = tpu.matmul %0, %1, %cst {dimension_numbers = #tpu.dot_dimension_numbers<[1], [0], [0], [1], [0, 0, 1, 1], [], []>} : vector<16x128xf32>, vector<128x128xf32>, vector<16x128xf32> -> vector<16x128xf32>
    %c0_3 = arith.constant 0 : index
    %c0_4 = arith.constant 0 : index
    %3 = vector.load %arg3[%c0_3, %c0_4] : memref<16x128xf32, #tpu.memory_space<vmem>>, vector<16x128xf32>
    tpu.vector_store %arg3[%c0_3, %c0_4], %2 {strides = array<i32>} : memref<16x128xf32, #tpu.memory_space<vmem>>, vector<16x128xf32>,
    return
  }
  func.func @transform_0(%arg0: i32) -> (i32, i32) {
    %c0_i32 = arith.constant 0 : i32
    %c0_i32_0 = arith.constant 0 : i32
    return %arg0, %c0_i32 : i32, i32
  }
  func.func @transform_1(%arg0: i32) -> (i32, i32) {
    %c0_i32 = arith.constant 0 : i32
    %c0_i32_0 = arith.constant 0 : i32
    %c0_i32_1 = arith.constant 0 : i32
    return %c0_i32, %c0_i32_0 : i32, i32
  }
  func.func @transform_2(%arg0: i32) -> (i32, i32) {
    %c0_i32 = arith.constant 0 : i32
    %c0_i32_0 = arith.constant 0 : i32
    return %arg0, %c0_i32 : i32, i32
  }
}

</mosaic_0001>

<bundles_post_ra>
// kernel: tpu_custom_call.1
= control target key start
LH: loop header
LB: loop body
LE: loop exit
PB: predicated region body
PF: predicated region fallthrough
CT: control target
= control target key end

     0   :  { %7 = vsyncpa [#allocation3], 0  ;;  %s244_s0 = inlined_call_operand.hbm [shape: f32[16,128], index: 0, kind: input, shape index: {}]   ;;  %s245_s1 = inlined_call_operand.hbm [shape: f32[128,128], index: 1, kind: input, shape index: {}]   ;;  %s246_s2 = inlined_call_operand.hbm [shape: f32[16,128], index: 2, kind: output, shape index: {}]  }
   0x1   :  { %8 = vsyncpa [#allocation6], 0 }
   0x2   :  { %9 = vsyncpa [#allocation4], 0  ;;  %s14_s11 = sshll.u32 %s244_s0, 4  ;;  %s206_s12 = smov [#allocation2]   ;;  %s15_s11 = int_to_ptr.hbm [resolvable:$true] %s14_s11 }
   0x3   :  { %s16_s13 = sshll.u32 %s206_s12, 4  ;;  %s27_s16 = sshll.u32 %s245_s1, 4  ;;  %s17_s13 = int_to_ptr.vmem [resolvable:$true] %s16_s13  ;;  %s28_s16 = int_to_ptr.hbm [resolvable:$true] %s27_s16 }
   0x4   :  { %s207_s17 = smov 128   ;;  %s208_s18 = smov 8  }
   0x5   :  { %22 = dma.hbm_to_vmem [thread:$0]  %s15_s11, 256, %s17_s13, [#allocation3], %s207_s17, %s207_s17, %s208_s18  }
   0x6   :  { %s209_s19 = smov [#allocation5]  }
   0x7   :  { %s29_s20 = sshll.u32 %s209_s19, 4  ;;  %s30_s20 = int_to_ptr.vmem [resolvable:$true] %s29_s20 }
   0x8   :  { %35 = dma.hbm_to_vmem [thread:$0]  %s28_s16, 2048, %s30_s20, [#allocation6], %s207_s17, %s207_s17, %s208_s18  }
   0x9   :  { %200 = dma.done.wait [#allocation3], 256  }
   0xa   :  { %201 = vsyncadd [#allocation3], 4294967040 }
   0xb   :  { %202 = dma.done.wait [#allocation6], 2048  }
   0xc   :  { %203 = vsyncadd [#allocation6], 4294965248  ;;  %v61_v0 = vld [vmem:[#allocation5 + $0x78] sm:$0xff]  ;;  %v60_v1 = vld [vmem:[#allocation5 + $0x70] sm:$0xff]  ;;  %s210_s0 = smov [#allocation7]   ;;  %s93_s23 = sshll.u32 %s246_s2, 4  ;;  %s94_s23 = int_to_ptr.hbm [resolvable:$true] %s93_s23 }
   0xd   :  { %62 = vmatpush.msra.mxu0 %v61_v0  ;;  %107 = vmatpush.msra.mxu1 %v61_v0  ;;  %v59_v2 = vld [vmem:[#allocation5 + $0x68] sm:$0xff]  ;;  %v58_v3 = vld [vmem:[#allocation5 + $0x60] sm:$0xff]  ;;  %v57_v4 = vld [vmem:[#allocation5 + $0x58] sm:$0xff]  ;;  %s91_s1 = sshll.u32 %s210_s0, 4  ;;  %s92_s1 = int_to_ptr.vmem [resolvable:$true] %s91_s1 }
   0xe   :  { %v56_v5 = vld [vmem:[#allocation5 + $0x50] sm:$0xff]  ;;  %v55_v6 = vld [vmem:[#allocation5 + $0x48] sm:$0xff]  ;;  %v54_v7 = vld [vmem:[#allocation5 + $0x40] sm:$0xff] }
   0xf   :  { %63 = vmatpush.msra.mxu0 %v60_v1  ;;  %108 = vmatpush.msra.mxu1 %v60_v1  ;;  %v53_v8 = vld [vmem:[#allocation5 + $0x38] sm:$0xff]  ;;  %v52_v9 = vld [vmem:[#allocation5 + $0x30] sm:$0xff]  ;;  %v51_v10 = vld [vmem:[#allocation5 + $0x28] sm:$0xff] }
  0x10   :  { %v50_v11 = vld [vmem:[#allocation5 + $0x20] sm:$0xff]  ;;  %v49_v12 = vld [vmem:[#allocation5 + $0x18] sm:$0xff]  ;;  %v48_v13 = vld [vmem:[#allocation5 + $0x10] sm:$0xff] }
  0x11   :  { %64 = vmatpush.msra.mxu0 %v59_v2  ;;  %109 = vmatpush.msra.mxu1 %v59_v2  ;;  %v47_v14 = vld [vmem:[#allocation5 + $0x8] sm:$0xff]  ;;  %v46_v15 = vld [vmem:[#allocation5] sm:$0xff]  ;;  %v44_v16 = vld [vmem:[#allocation2] sm:$0xff] }
  0x12   :  { %v45_v17 = vld [vmem:[#allocation2 + $0x8] sm:$0xff] }
  0x13   :  { %65 = vmatpush.msra.mxu0 %v58_v3  ;;  %110 = vmatpush.msra.mxu1 %v58_v3 }
  0x15   :  { %66 = vmatpush.msra.mxu0 %v57_v4  ;;  %111 = vmatpush.msra.mxu1 %v57_v4 }
  0x17   :  { %67 = vmatpush.msra.mxu0 %v56_v5  ;;  %112 = vmatpush.msra.mxu1 %v56_v5 }
  0x19   :  { %68 = vmatpush.msra.mxu0 %v55_v6  ;;  %113 = vmatpush.msra.mxu1 %v55_v6 }
  0x1b   :  { %69 = vmatpush.msra.mxu0 %v54_v7  ;;  %114 = vmatpush.msra.mxu1 %v54_v7 }
  0x1d   :  { %70 = vmatpush.msra.mxu0 %v53_v8  ;;  %115 = vmatpush.msra.mxu1 %v53_v8 }
  0x1f   :  { %71 = vmatpush.msra.mxu0 %v52_v9  ;;  %116 = vmatpush.msra.mxu1 %v52_v9 }
  0x21   :  { %72 = vmatpush.msra.mxu0 %v51_v10  ;;  %117 = vmatpush.msra.mxu1 %v51_v10 }
  0x23   :  { %73 = vmatpush.msra.mxu0 %v50_v11  ;;  %118 = vmatpush.msra.mxu1 %v50_v11 }
  0x25   :  { %74 = vmatpush.msra.mxu0 %v49_v12  ;;  %119 = vmatpush.msra.mxu1 %v49_v12 }
  0x27   :  { %75 = vmatpush.msra.mxu0 %v48_v13  ;;  %120 = vmatpush.msra.mxu1 %v48_v13 }
  0x29   :  { %76 = vmatpush.msra.mxu0 %v47_v14  ;;  %121 = vmatpush.msra.mxu1 %v47_v14 }
  0x2b   :  { %77 = vmatpush.msra.mxu0 %v46_v15  ;;  %122 = vmatpush.msra.mxu1 %v46_v15 }
  0x2c   :  { %78 = vmatmul.f32.vlgmr.msra.gmra.mxu0 %v44_v16  ;;  %81 = vmatmul.f32.vlgmr.msra.gmra.mxu1 %v45_v17 }
  0xa9   :  { %v79_v18 = vpop.f32.mrf.mxu0  ;;  %v82_v19 = vpop.f32.mrf.mxu1 }
  0xaa   :  { %85 = vst [vmem:[#allocation7] sm:$0xff] %v79_v18 }
  0xab   :  { %86 = vst [vmem:[#allocation7 + $0x8] sm:$0xff] %v82_v19 }
  0xac   :  { %99 = dma.vmem_to_hbm [thread:$0]  %s92_s1, 256, %s94_s23, [#allocation4], %s207_s17, %s207_s17, %s208_s18  }
  0xad   :  { %204 = dma.done.wait [#allocation4], 256  }
  0xae   :  { %205 = vsyncadd [#allocation4], 4294967040 }
  0xaf   :  { %104 = vsyncpa [#allocation3], 1 }
  0xb0   :  { %105 = vsyncpa [#allocation6], 1 }
  0xb1   :  { %106 = vsyncpa [#allocation4], 1 }

</bundles_post_ra>
